<compile_context>
chip_gen: v6e
topology: v6e:2x2x1
jax: 0.10.0
libtpu: 0.0.40
codegen_flags: <defaults>
</compile_context>

<pallas_src>
import jax
import jax.numpy as jnp
from jax.experimental import pallas as pl
from jax.experimental.pallas import tpu as pltpu

IN_DIM = 1024
HID_DIM = 1024
OUT_DIM = 1
TK = 512  # hidden-dim tile per grid step (W1 tile = 1024x512 bf16 = 1 MiB)


def mlp_kernel(x_ref, w1_ref, w2_ref, c_ref, o_ref, acc_ref):
    j = pl.program_id(0)

    @pl.when(j == 0)
    def _():
        acc_ref[...] = jnp.zeros_like(acc_ref)

    # fc1 tile: (B, 1024) @ (1024, TK) on the MXU, bf16 inputs, f32 accumulate.
    h = jnp.dot(x_ref[...], w1_ref[...], preferred_element_type=jnp.float32)

    # fc2 contribution for this hidden tile: slice the resident fc2 weight row
    # (aligned dynamic slice), VPU multiply + lane reduce, accumulate in scratch.
    off = pl.multiple_of(j * TK, TK)
    w2_tile = w2_ref[:, pl.ds(off, TK)]                    # (1, TK) f32
    acc_ref[...] += jnp.sum(h * w2_tile, axis=-1, keepdims=True)

    @pl.when(j == pl.num_programs(0) - 1)
    def _():
        # c == b1 @ w2.T + b2 (precomputed); valid because there is no hidden
        # nonlinearity between fc1 and fc2.
        o_ref[...] = jax.nn.sigmoid(acc_ref[...] + c_ref[...]).astype(o_ref.dtype)


def mlp_forward(x, w1_bf16, b1, w2_row, b2):
    """x: (B, 1024) f32; w1_bf16: (1024, 1024) bf16 (pre-transposed vs torch);
    b1: (1, 1024) f32; w2_row: (1, 1024) f32 (== torch fc2.weight); b2: (1, 1) f32."""
    B = x.shape[0]
    n_tiles = HID_DIM // TK

    x_bf = x.astype(jnp.bfloat16)                 # cast once, resident in-kernel
    c = b1 @ w2_row.T + b2                        # (1, 1) fused bias constant

    return pl.pallas_call(
        mlp_kernel,
        out_shape=jax.ShapeDtypeStruct((B, OUT_DIM), jnp.float32),
        grid_spec=pltpu.PrefetchScalarGridSpec(
            num_scalar_prefetch=0,
            grid=(n_tiles,),
            in_specs=[
                # x stays resident (same block every step -> no re-DMA)
                pl.BlockSpec((B, IN_DIM), lambda j: (0, 0)),
                # W1 streamed tile-by-tile along HID_DIM (bf16)
                pl.BlockSpec((IN_DIM, TK), lambda j: (0, j)),
                # fc2 weight row resident (4 KiB), sliced in-kernel
                pl.BlockSpec((1, HID_DIM), lambda j: (0, 0)),
                # fused bias constant
                pl.BlockSpec((1, OUT_DIM), lambda j: (0, 0)),
            ],
            out_specs=pl.BlockSpec((B, OUT_DIM), lambda j: (0, 0)),
            scratch_shapes=[pltpu.VMEM((B, OUT_DIM), jnp.float32)],
        ),
        compiler_params=pltpu.CompilerParams(
            dimension_semantics=("arbitrary",),   # reduction over hidden tiles
        ),
    )(x_bf, w1_bf16, w2_row, c)


def init_params(key):
    """PyTorch nn.Linear-style init (uniform +-1/sqrt(fan_in)), kernel layout."""
    k1, k2, k3, k4 = jax.random.split(key, 4)
    bound1 = 1.0 / jnp.sqrt(IN_DIM)
    bound2 = 1.0 / jnp.sqrt(HID_DIM)
    w1 = jax.random.uniform(k1, (IN_DIM, HID_DIM), jnp.float32, -bound1, bound1)
    b1 = jax.random.uniform(k2, (1, HID_DIM), jnp.float32, -bound1, bound1)
    w2 = jax.random.uniform(k3, (1, HID_DIM), jnp.float32, -bound2, bound2)  # row layout
    b2 = jax.random.uniform(k4, (1, OUT_DIM), jnp.float32, -bound2, bound2)
    return w1, b1, w2, b2


if __name__ == "__main__":
    key = jax.random.PRNGKey(0)
    k_x, k_p = jax.random.split(key)

    B = 8  # small batch (multiple of 8 sublanes)
    x = jax.random.normal(k_x, (B, IN_DIM), jnp.float32)
    w1, b1, w2, b2 = init_params(k_p)
    w1_bf16 = w1.astype(jnp.bfloat16)  # weights stored/streamed in bf16

    out = jax.block_until_ready(mlp_forward(x, w1_bf16, b1, w2, b2))
    assert out.shape == (B, OUT_DIM)

    # Tight check vs. a reference using the same bf16-cast operands (isolates
    # kernel correctness from the deliberate bf16 quantization of x / W1).
    x_q = x.astype(jnp.bfloat16).astype(jnp.float32)
    w1_q = w1_bf16.astype(jnp.float32)
    ref_q = jax.nn.sigmoid((x_q @ w1_q + b1) @ w2.T + b2)
    assert jnp.allclose(out, ref_q, atol=1e-4, rtol=1e-4), "mismatch vs bf16-consistent ref"

    # Loose check vs. the full-f32 PyTorch-equivalent forward (semantics check).
    ref_f32 = jax.nn.sigmoid((x @ w1 + b1) @ w2.T + b2)
    assert jnp.allclose(out, ref_f32, atol=5e-3, rtol=5e-3), "mismatch vs f32 ref"

    print("KERNEL_OK")
</pallas_src>

<mosaic_0001>
module attributes {stable_mosaic.version = 11 : i64} {
  func.func @mlp_kernel(%arg0: i32, %arg1: memref<8x1024xbf16, #tpu.memory_space<vmem>>, %arg2: memref<1024x512xbf16, #tpu.memory_space<vmem>>, %arg3: memref<1x1024xf32, #tpu.memory_space<vmem>>, %arg4: memref<1x1xf32, #tpu.memory_space<vmem>>, %arg5: memref<8x1xf32, #tpu.memory_space<vmem>>, %arg6: memref<8x1xf32, #tpu.memory_space<vmem>>) attributes {dimension_semantics = [#tpu.dimension_semantics<arbitrary>], iteration_bounds = array<i64: 2>, scalar_prefetch = 0 : i64, scratch_operands = 1 : i64, tpu.core_type = #tpu.core_type<tc>, window_params = [{pipeline_mode = #tpu.pipeline_mode<synchronous>, transform_indices = @transform_0, window_bounds = array<i64: 8, 1024>}, {transform_indices = @transform_1, window_bounds = array<i64: 1024, 512>}, {pipeline_mode = #tpu.pipeline_mode<synchronous>, transform_indices = @transform_2, window_bounds = array<i64: 1, 1024>}, {pipeline_mode = #tpu.pipeline_mode<synchronous>, transform_indices = @transform_3, window_bounds = array<i64: 1, 1>}, {pipeline_mode = #tpu.pipeline_mode<synchronous>, transform_indices = @transform_4, window_bounds = array<i64: 8, 1>}]} {
    %c0_i32 = arith.constant 0 : i32
    %0 = arith.cmpi eq, %arg0, %c0_i32 : i32
    %1 = arith.extui %0 : i1 to i32
    %c0_i32_0 = arith.constant 0 : i32
    %2 = arith.cmpi ne, %1, %c0_i32_0 : i32
    scf.if %2 {
      %cst_11 = arith.constant 0.000000e+00 : f32
      %20 = vector.broadcast %cst_11 : f32 to vector<8x1xf32>
      %c0_12 = arith.constant 0 : index
      %c0_13 = arith.constant 0 : index
      %21 = vector.load %arg6[%c0_12, %c0_13] : memref<8x1xf32, #tpu.memory_space<vmem>>, vector<8x1xf32>
      tpu.vector_store %arg6[%c0_12, %c0_13], %20 {strides = array<i32>} : memref<8x1xf32, #tpu.memory_space<vmem>>, vector<8x1xf32>,
    } else {
    }
    %c0 = arith.constant 0 : index
    %c0_1 = arith.constant 0 : index
    %3 = vector.load %arg1[%c0, %c0_1] : memref<8x1024xbf16, #tpu.memory_space<vmem>>, vector<8x1024xbf16>
    %c0_2 = arith.constant 0 : index
    %c0_3 = arith.constant 0 : index
    %4 = vector.load %arg2[%c0_2, %c0_3] : memref<1024x512xbf16, #tpu.memory_space<vmem>>, vector<1024x512xbf16>
    %cst = arith.constant dense<0.000000e+00> : vector<8x512xf32>
    %5 = tpu.matmul %3, %4, %cst {dimension_numbers = #tpu.dot_dimension_numbers<[1], [0], [0], [1], [0, 0, 1, 1], [], []>} : vector<8x1024xbf16>, vector<1024x512xbf16>, vector<8x512xf32> -> vector<8x512xf32>
    %c512_i32 = arith.constant 512 : i32
    %6 = arith.muli %arg0, %c512_i32 : i32
    %7 = tpu.assume_multiple %6, 512 : i32
    %c0_4 = arith.constant 0 : index
    %8 = arith.index_cast %7 : i32 to index
    %9 = vector.load %arg3[%c0_4, %8] : memref<1x1024xf32, #tpu.memory_space<vmem>>, vector<1x512xf32>
    %c0_5 = arith.constant 0 : index
    %c0_6 = arith.constant 0 : index
    %10 = vector.load %arg6[%c0_5, %c0_6] : memref<8x1xf32, #tpu.memory_space<vmem>>, vector<8x1xf32>
    %11 = vector.broadcast %9 : vector<1x512xf32> to vector<8x512xf32>
    %12 = arith.mulf %5, %11 : vector<8x512xf32>
    %cst_7 = arith.constant dense<0.000000e+00> : vector<8xf32>
    %13 = vector.multi_reduction <add>, %12, %cst_7 [1] : vector<8x512xf32> to vector<8xf32>
    %14 = vector.shape_cast %13 : vector<8xf32> to vector<8x1xf32>
    %15 = arith.addf %10, %14 : vector<8x1xf32>
    %c0_8 = arith.constant 0 : index
    %c0_9 = arith.constant 0 : index
    %16 = vector.load %arg6[%c0_8, %c0_9] : memref<8x1xf32, #tpu.memory_space<vmem>>, vector<8x1xf32>
    tpu.vector_store %arg6[%c0_8, %c0_9], %15 {strides = array<i32>} : memref<8x1xf32, #tpu.memory_space<vmem>>, vector<8x1xf32>,
    %c1_i32 = arith.constant 1 : i32
    %17 = arith.cmpi eq, %arg0, %c1_i32 : i32
    %18 = arith.extui %17 : i1 to i32
    %c0_i32_10 = arith.constant 0 : i32
    %19 = arith.cmpi ne, %18, %c0_i32_10 : i32
    scf.if %19 {
      %c0_11 = arith.constant 0 : index
      %c0_12 = arith.constant 0 : index
      %20 = vector.load %arg6[%c0_11, %c0_12] : memref<8x1xf32, #tpu.memory_space<vmem>>, vector<8x1xf32>
      %c0_13 = arith.constant 0 : index
      %c0_14 = arith.constant 0 : index
      %21 = vector.load %arg4[%c0_13, %c0_14] : memref<1x1xf32, #tpu.memory_space<vmem>>, vector<1x1xf32>
      %22 = vector.broadcast %21 : vector<1x1xf32> to vector<8x1xf32>
      %23 = arith.addf %20, %22 : vector<8x1xf32>
      %24 = arith.negf %23 : vector<8x1xf32>
      %25 = math.exp %24 : vector<8x1xf32>
      %cst_15 = arith.constant 1.000000e+00 : f32
      %26 = vector.broadcast %cst_15 : f32 to vector<8x1xf32>
      %27 = arith.addf %26, %25 : vector<8x1xf32>
      %28 = arith.divf %26, %27 : vector<8x1xf32>
      %c0_16 = arith.constant 0 : index
      %c0_17 = arith.constant 0 : index
      %29 = vector.load %arg5[%c0_16, %c0_17] : memref<8x1xf32, #tpu.memory_space<vmem>>, vector<8x1xf32>
      tpu.vector_store %arg5[%c0_16, %c0_17], %28 {strides = array<i32>} : memref<8x1xf32, #tpu.memory_space<vmem>>, vector<8x1xf32>,
    } else {
    }
    return
  }
  func.func @transform_0(%arg0: i32) -> (i32, i32) {
    %c0_i32 = arith.constant 0 : i32
    %c0_i32_0 = arith.constant 0 : i32
    %c0_i32_1 = arith.constant 0 : i32
    return %c0_i32, %c0_i32_0 : i32, i32
  }
  func.func @transform_1(%arg0: i32) -> (i32, i32) {
    %c0_i32 = arith.constant 0 : i32
    %c0_i32_0 = arith.constant 0 : i32
    return %c0_i32, %arg0 : i32, i32
  }
  func.func @transform_2(%arg0: i32) -> (i32, i32) {
    %c0_i32 = arith.constant 0 : i32
    %c0_i32_0 = arith.constant 0 : i32
    %c0_i32_1 = arith.constant 0 : i32
    return %c0_i32, %c0_i32_0 : i32, i32
  }
  func.func @transform_3(%arg0: i32) -> (i32, i32) {
    %c0_i32 = arith.constant 0 : i32
    %c0_i32_0 = arith.constant 0 : i32
    %c0_i32_1 = arith.constant 0 : i32
    return %c0_i32, %c0_i32_0 : i32, i32
  }
  func.func @transform_4(%arg0: i32) -> (i32, i32) {
    %c0_i32 = arith.constant 0 : i32
    %c0_i32_0 = arith.constant 0 : i32
    %c0_i32_1 = arith.constant 0 : i32
    return %c0_i32, %c0_i32_0 : i32, i32
  }
}

</mosaic_0001>

<bundles_post_ra>
// kernel: tpu_custom_call.1
= control target key start
LH: loop header
LB: loop body
LE: loop exit
PB: predicated region body
PF: predicated region fallthrough
CT: control target
= control target key end

     0   :  { %s3610_s0 = inlined_call_operand.hbm [shape: bf16[8,1024], index: 0, kind: input, shape index: {}]   ;;  %s3611_s1 = inlined_call_operand.hbm [shape: bf16[1024,1024], index: 1, kind: input, shape index: {}]   ;;  %s3612_s2 = inlined_call_operand.hbm [shape: f32[1,1024], index: 2, kind: input, shape index: {}]   ;;  %s3613_s3 = inlined_call_operand.<no memory space> [shape: f32[1,1], index: 3, kind: input, shape index: {}]   ;;  %s3614_s4 = inlined_call_operand.vmem [shape: f32[8,1], index: 4, kind: output, shape index: {}]  }
   0x1   :  { %v9_v0 = vstv %s3613_s3 }
   0x2   :  { %10 = vst [vmem:[#allocation3] sm:$0x1] %v9_v0 }
   0x3   :  { %11 = vsyncpa [#allocation5], 0 }
   0x4   :  { %12 = vsyncpa [#allocation7], 0 }
   0x5   :  { %14 = vsyncpa [#allocation7 + $0x1], 0  ;;  %s3156_s17 = smov 0   ;;  %s3158_s18 = smov 0  }
   0x6   :  { %s3160_s19 = smov 0   ;;  %s3162_s20 = smov 0  }
   0x7 LB: > { %s3175_s3 = sadd.s32 4294967295, %s3119_s20   ;;  %s3178_s21 = sadd.s32 1, %s3119_s20   ;;  %s3119_s20 = sphi %s3162_s20, %s3635_s20   ;;  %s3115_s19 = sphi %s3160_s19, %s3634_s19   ;;  %s3111_s18 = sphi %s3158_s18, %s3633_s18   ;;  %s3107_s17 = sphi %s3156_s17, %s3632_s17  }
   0x8   : > { %s45_s22 = ssub.s32 %s3119_s20, %s3178_s21  ;;  %s48_s23 = sadd.s32 1, %s3115_s19 }
   0x9   : > { %p46_p0 = scmp.eq.s32.totalorder %s45_s22, 0  ;;  %p55_p1 = scmp.ne.s32.totalorder %s3115_s19, %s3111_s18 }
   0xa   : > { %p56_p2 = scmp.eq.s32.totalorder %s3119_s20, 0  ;;  %p61_p3 = scmp.ne.s32.totalorder %s3111_s18, %s3107_s17 }
   0xb   : > { %s3188_s24 = scalar_select %p46_p0, %s3115_s19, %s48_s23  }
   0xc   : > { %p3190_p4 = por %p56_p2, %p55_p1  ;;  %p3615_p5 = scmp.eq.s32.totalorder %s3175_s3, 0 }
   0xd   : > { %p2254_p6 = scmp.ge.s32.totalorder %s3119_s20, 1  ;;  %p135_p7 = scmp.lt.s32.totalorder %s3119_s20, 3 }
   0xe   : > { %p3199_p8 = por %p3615_p5, %p61_p3  ;;  %s3121_s28 = smov [#allocation8]  }
   0xf   : > { %p3204_p10 = pnand %p2254_p6, %p135_p7  ;;  %s159_s29 = sshll.u32 %s3121_s28, 4  ;;  %s160_s29 = int_to_ptr.vmem [resolvable:$true] %s159_s29 }
  0x10   : > { %s3620_s26 = scalar_select %p3199_p8, 1, 0 }
  0x11   : > { %s3621_s27 = scalar_select %p3204_p10, 1, 0 }
  0x12   : > { %p2547_p11 = pneg %p3204_p10  ;;  %p2560_p12 = scmp.lt.s32.totalorder %s3119_s20, 2 }
  0x13   : > { %s3122_s5 = smov [#allocation4]   ;;  %s173_s8 = sand.u32 1, %s3119_s20  }
  0x14   : > { %p3213_p13 = pnand %p2547_p11, %p3615_p5  ;;  %s148_s6 = sshll.u32 %s3122_s5, 4  ;;  %s149_s6 = int_to_ptr.vmem [resolvable:$true] %s148_s6 }
  0x15   : > { %p3219_p0 = pnand %p2560_p12, %p3190_p4  ;;  %s3008_s9 = scalar_lea.vmem %s160_s29, 128 }
  0x16   : > { %p2999_p1 = pneg %p3213_p13  ;;  %p3009_p2 = scmp.ne.s32.totalorder %s160_s29, %s3008_s9 }
  0x17   : > { %s3623_s7 = scalar_select %p3219_p0, 1, 0 }
  0x18   : > { %p3011_p3 = pnand %p3009_p2, %p2999_p1  ;;  %p3016_p7 = scmp.lt.s32.totalorder %s160_s29, %s160_s29 }
  0x19   : > { %p3017_p11 = scmp.lt.s32.totalorder %s3008_s9, %s3008_s9 }
  0x1a   : > { %p3012_p6 = pneg %p3011_p3 }
  0x1b   : > { %p3018_p9 = por %p3017_p11, %p3016_p7 }
  0x1d   : > { %p3019_p5 = pnand %p3018_p9, %p3012_p6 }
  0x1f   : > { %3022 = shalt.err (!%p3019_p5)
}
  0x20   : > { %2553 = dma.hbm_to_vmem [thread:$0]  (!%p3213_p13), %s3612_s2, 128, %s160_s29, [#allocation7]  }
  0x21   : > { %s3034_s12 = scalar_lea.vmem %s149_s6, 512  ;;  %p3042_p2 = scmp.lt.s32.totalorder %s149_s6, %s149_s6 }
  0x22   : > { %p3035_p4 = scmp.ne.s32.totalorder %s149_s6, %s3034_s12  ;;  %p3043_p3 = scmp.lt.s32.totalorder %s3034_s12, %s3034_s12 }
  0x24   : > { %p3037_p12 = pnand %p3035_p4, %p2999_p1  ;;  %p3044_p10 = por %p3043_p3, %p3042_p2 }
  0x26   : > { %p3038_p8 = pneg %p3037_p12 }
  0x28   : > { %p3045_p0 = pnand %p3044_p10, %p3038_p8 }
  0x2a   : > { %3048 = shalt.err (!%p3045_p0)
}
  0x2b   : > { %2550 = dma.hbm_to_vmem [thread:$0]  (!%p3213_p13), %s3610_s0, 512, %s149_s6, [#allocation5]  }
  0x2c   : > { %s175_s15 = sand.u32 1, %s3115_s19   ;;  %s2536_s16 = sshll.u32 %s3119_s20, 8 }
  0x2d   : > { %s2258_s17 = sshll.u32 %s175_s15, 11  ;;  %s3247_s25 = scalar_lea.hbm %s3611_s1, %s2536_s16 }
  0x2e   : > { %s177_s28 = scalar_lea.vmem [#allocation6], %s2258_s17  ;;  %s3251_s30 = scalar_lea.sflag [#allocation7], %s173_s8 }
  0x2f   : > { %s184_s29 = sshll.u32 %s177_s28, 4  ;;  %s3049_s5 = scalar_lea.hbm %s3247_s25, 32768  ;;  %s3249_s29 = int_to_ptr.vmem [resolvable:$true] %s184_s29 }
  0x30   : > { %p3050_p5 = scmp.ne.s32.totalorder %s3247_s25, %s3049_s5  ;;  %p3624_p8 = scmp.ne.s32.totalorder %s3623_s7, 0 }
  0x31   : > { %s3054_s9 = scalar_lea.hbm %s3611_s1, 65536  ;;  %p3055_p0 = scmp.lt.s32.totalorder %s3247_s25, %s3611_s1 }
  0x32   : > { %p3051_p9 = pneg %p3624_p8  ;;  %p3056_p1 = scmp.lt.s32.totalorder %s3054_s9, %s3049_s5 }
  0x34   : > { %p3052_p10 = pnand %p3051_p9, %p3050_p5  ;;  %p3057_p6 = por %p3056_p1, %p3055_p0 }
  0x36   : > { %p3053_p13 = pneg %p3052_p10 }
  0x38   : > { %p3058_p7 = pnand %p3057_p6, %p3053_p13 }
  0x3a   : > { %3061 = shalt.err (!%p3058_p7)
}
  0x3b   : > { %s3062_s8 = scalar_lea.vmem %s3249_s29, 32768  ;;  %s3123_s12 = smov [#allocation6]  }
  0x3c   : > { %p3063_p11 = scmp.ne.s32.totalorder %s3249_s29, %s3062_s8  ;;  %s3067_s13 = sshll.u32 %s3123_s12, 4  ;;  %s3068_s13 = int_to_ptr.vmem [resolvable:$false] %s3067_s13 }
  0x3d   : > { %s3069_s14 = scalar_lea.vmem %s3068_s13, 65536  ;;  %p3070_p2 = scmp.lt.s32.totalorder %s3249_s29, %s3068_s13 }
  0x3e   : > { %p3065_p4 = pnand %p3063_p11, %p3051_p9  ;;  %p3071_p3 = scmp.lt.s32.totalorder %s3069_s14, %s3062_s8 }
  0x40   : > { %p3066_p12 = pneg %p3065_p4  ;;  %p3072_p5 = por %p3071_p3, %p3070_p2 }
  0x42   : > { %p3073_p10 = pnand %p3072_p5, %p3066_p12 }
  0x44   : > { %3076 = shalt.err (!%p3073_p10)
}
  0x45   : > { %s3124_s15 = smov 512   ;;  %s3125_s16 = smov 256  }
  0x46   : > { %s3126_s17 = smov 16   ;;  %p3625_p9 = scmp.ne.s32.totalorder %s3621_s27, 0 }
  0x47   : > { %2557 = dma.hbm_to_vmem [thread:$0]  (!%p3624_p8), %s3247_s25, 32768, %s3249_s29, %s3251_s30, %s3124_s15, %s3125_s16, %s3126_s17  }
  0x48   : > { %196 = sbr.rel (%p3625_p9) target bundleno = 738 (0x2e2), region = 36  ;;  %p3626_p13 = scmp.eq.s32.totalorder (!%p3625_p9), %s3175_s3, 0 }
  0x4d   : > { %3094 = dma.done.wait (%p3626_p13), [#allocation5], 512   ;;  %p3627_p0 = pmov %p3626_p13 }
  0x4e   : > { %s202_s22 = sand.u32 1, %s3175_s3   ;;  %s204_s23 = sand.u32 1, %s3111_s18  }
  0x4f   : > { %3096 = vsyncadd (%p3627_p0), [#allocation5], 4294966784  ;;  %s2263_s28 = sshll.u32 %s204_s23, 11  ;;  %s203_s5 = scalar_lea.sflag [#allocation7], %s202_s22 }
  0x50   : > { %s3280_s20 = scalar_lea.vmem [#allocation6], %s2263_s28  ;;  %p3628_p1 = scmp.ne.s32.totalorder %s3620_s26, 0 }
  0x52   : > { %3098 = dma.done.wait (%p3628_p1), %s203_s5, 32768  }
  0x53   : > { %3100 = vsyncadd (%p3628_p1), %s203_s5, 4294934528  ;;  %p3629_p8 = pmov %p3627_p0 }
  0x54   : > { %p3630_p6 = pmov %p3627_p0 }
  0x55   : > { %3102 = dma.done.wait (%p3629_p8), [#allocation7], 128  }
  0x56   : > { %3104 = vsyncadd (%p3630_p6), [#allocation7], 4294967168  ;;  %p3631_p7 = scmp.ne.s32.totalorder %s3175_s3, 0 }
  0x58   : > { %234 = sbr.rel (%p3631_p7) target bundleno = 95 (0x5f), region = 52 }
  0x5d   : > { %vm235_vm0 = vcmask 7168   ;;  %v3127_v1 = vmov 0.0  }
  0x5e   : > { %236 = vst.msk [vmem:[#allocation2] sm:$0xff] %vm235_vm0, %v3127_v1 }
  0x5f PF: > { %v2601_v2 = vld [vmem:[%s3280_s20 + $0xe4] ss:$16 sps:$4 sm:$0xff]   ;;  %v2605_v4 = vld [vmem:[%s3280_s20 + $0xe0] ss:$16 sps:$4 sm:$0xff]   ;;  %v238_v50 = vld [vmem:[#allocation4 + $0x8] sm:$0xff]  ;;  %s2530_s26 = sshll.u32 %s3175_s3, 9 }
  0x60   : > { %v2603_v3 = vld [vmem:[%s3280_s20 + $0x2e4] ss:$16 sps:$4 sm:$0xff]   ;;  %1805 = vmatprep.subr.bf16.mxu0 %v2601_v2  ;;  %v2606_v5 = vld [vmem:[%s3280_s20 + $0x2e0] ss:$16 sps:$4 sm:$0xff]   ;;  %v3342_v53 = vcombine.high %v238_v50, %v238_v50  ;;  %s2134_s27 = sshra.s32 %s2530_s26, 7  ;;  %vm2170_vm1 = vcmask 7168  }
  0x61   : > { %1846 = vmatprep.subr.bf16.mxu1 %v2603_v3  ;;  %v2607_v6 = vld [vmem:[%s3280_s20 + $0xc4] ss:$16 sps:$4 sm:$0xff]   ;;  %1806 = vmatpush1.bf16.msra.mxu0 %v2605_v4  ;;  %v2611_v8 = vld [vmem:[%s3280_s20 + $0xc0] ss:$16 sps:$4 sm:$0xff]   ;;  %s2136_s7 = scalar_lea.vmem [#allocation8], %s2134_s27  ;;  %p2531_p11 = scmp.ne.s32.totalorder %s3175_s3, 1 }
  0x62   : > { %1847 = vmatpush1.bf16.msra.mxu1 %v2606_v5  ;;  %v2609_v7 = vld [vmem:[%s3280_s20 + $0x2c4] ss:$16 sps:$4 sm:$0xff]   ;;  %1807 = vmatprep.subr.bf16.mxu0 %v2607_v6  ;;  %v2612_v9 = vld [vmem:[%s3280_s20 + $0x2c0] ss:$16 sps:$4 sm:$0xff]  }
  0x63   : > { %1848 = vmatprep.subr.bf16.mxu1 %v2609_v7  ;;  %v2613_v10 = vld [vmem:[%s3280_s20 + $0xa4] ss:$16 sps:$4 sm:$0xff]   ;;  %v2617_v12 = vld [vmem:[%s3280_s20 + $0xa0] ss:$16 sps:$4 sm:$0xff]   ;;  %1878 = vmatprep.mubr.bf16.mxu1 %v3342_v53 }
  0x64   : > { %v2615_v11 = vld [vmem:[%s3280_s20 + $0x2a4] ss:$16 sps:$4 sm:$0xff]   ;;  %v2618_v13 = vld [vmem:[%s3280_s20 + $0x2a0] ss:$16 sps:$4 sm:$0xff]  }
  0x65   : > { %1808 = vmatpush1.bf16.msra.mxu0 %v2611_v8  ;;  %v2619_v14 = vld [vmem:[%s3280_s20 + $0x84] ss:$16 sps:$4 sm:$0xff]   ;;  %v2623_v16 = vld [vmem:[%s3280_s20 + $0x80] ss:$16 sps:$4 sm:$0xff]  }
  0x66   : > { %1849 = vmatpush1.bf16.msra.mxu1 %v2612_v9  ;;  %1809 = vmatprep.subr.bf16.mxu0 %v2613_v10  ;;  %v2621_v15 = vld [vmem:[%s3280_s20 + $0x284] ss:$16 sps:$4 sm:$0xff]   ;;  %v2624_v17 = vld [vmem:[%s3280_s20 + $0x280] ss:$16 sps:$4 sm:$0xff]   ;;  %v3366_v9 = vcombine.low %v238_v50, %v238_v50 }
  0x67   : > { %1850 = vmatprep.subr.bf16.mxu1 %v2615_v11  ;;  %v2625_v18 = vld [vmem:[%s3280_s20 + $0x64] ss:$16 sps:$4 sm:$0xff]   ;;  %v2629_v20 = vld [vmem:[%s3280_s20 + $0x60] ss:$16 sps:$4 sm:$0xff]  }
  0x68   : > { %v2627_v19 = vld [vmem:[%s3280_s20 + $0x264] ss:$16 sps:$4 sm:$0xff]   ;;  %v2630_v21 = vld [vmem:[%s3280_s20 + $0x260] ss:$16 sps:$4 sm:$0xff]  }
  0x69   : > { %1810 = vmatpush1.bf16.msra.mxu0 %v2617_v12  ;;  %v2631_v22 = vld [vmem:[%s3280_s20 + $0x44] ss:$16 sps:$4 sm:$0xff]   ;;  %v2635_v24 = vld [vmem:[%s3280_s20 + $0x40] ss:$16 sps:$4 sm:$0xff]  }
  0x6a   : > { %1851 = vmatpush1.bf16.msra.mxu1 %v2618_v13  ;;  %1811 = vmatprep.subr.bf16.mxu0 %v2619_v14  ;;  %v2633_v23 = vld [vmem:[%s3280_s20 + $0x244] ss:$16 sps:$4 sm:$0xff]   ;;  %v2636_v25 = vld [vmem:[%s3280_s20 + $0x240] ss:$16 sps:$4 sm:$0xff]  }
  0x6b   : > { %1852 = vmatprep.subr.bf16.mxu1 %v2621_v15  ;;  %v2637_v26 = vld [vmem:[%s3280_s20 + $0x24] ss:$16 sps:$4 sm:$0xff]   ;;  %v2641_v28 = vld [vmem:[%s3280_s20 + $0x20] ss:$16 sps:$4 sm:$0xff]  }
  0x6c   : > { %v2639_v27 = vld [vmem:[%s3280_s20 + $0x224] ss:$16 sps:$4 sm:$0xff]   ;;  %v2642_v29 = vld [vmem:[%s3280_s20 + $0x220] ss:$16 sps:$4 sm:$0xff]  }
  0x6d   : > { %1812 = vmatpush1.bf16.msra.mxu0 %v2623_v16  ;;  %v2643_v30 = vld [vmem:[%s3280_s20 + $0x4] ss:$16 sps:$4 sm:$0xff]   ;;  %v2647_v32 = vld [vmem:[%s3280_s20] ss:$16 sps:$4 sm:$0xff]  }
  0x6e   : > { %1853 = vmatpush1.bf16.msra.mxu1 %v2624_v17  ;;  %1813 = vmatprep.subr.bf16.mxu0 %v2625_v18  ;;  %v2645_v31 = vld [vmem:[%s3280_s20 + $0x204] ss:$16 sps:$4 sm:$0xff]   ;;  %v2648_v33 = vld [vmem:[%s3280_s20 + $0x200] ss:$16 sps:$4 sm:$0xff]  }
  0x6f   : > { %1854 = vmatprep.subr.bf16.mxu1 %v2627_v19  ;;  %v2649_v34 = vld [vmem:[%s3280_s20 + $0x1e4] ss:$16 sps:$4 sm:$0xff]   ;;  %v2653_v36 = vld [vmem:[%s3280_s20 + $0x1e0] ss:$16 sps:$4 sm:$0xff]  }
  0x70   : > { %v2651_v35 = vld [vmem:[%s3280_s20 + $0x3e4] ss:$16 sps:$4 sm:$0xff]   ;;  %v2654_v37 = vld [vmem:[%s3280_s20 + $0x3e0] ss:$16 sps:$4 sm:$0xff]  }
  0x71   : > { %1814 = vmatpush1.bf16.msra.mxu0 %v2629_v20  ;;  %v2655_v38 = vld [vmem:[%s3280_s20 + $0x1c4] ss:$16 sps:$4 sm:$0xff]   ;;  %v2659_v40 = vld [vmem:[%s3280_s20 + $0x1c0] ss:$16 sps:$4 sm:$0xff]  }
  0x72   : > { %1855 = vmatpush1.bf16.msra.mxu1 %v2630_v21  ;;  %1815 = vmatprep.subr.bf16.mxu0 %v2631_v22  ;;  %v2657_v39 = vld [vmem:[%s3280_s20 + $0x3c4] ss:$16 sps:$4 sm:$0xff]   ;;  %v2660_v41 = vld [vmem:[%s3280_s20 + $0x3c0] ss:$16 sps:$4 sm:$0xff]  }
  0x73   : > { %1856 = vmatprep.subr.bf16.mxu1 %v2633_v23  ;;  %v2661_v42 = vld [vmem:[%s3280_s20 + $0x1a4] ss:$16 sps:$4 sm:$0xff]   ;;  %v2665_v44 = vld [vmem:[%s3280_s20 + $0x1a0] ss:$16 sps:$4 sm:$0xff]  }
  0x74   : > { %v2663_v43 = vld [vmem:[%s3280_s20 + $0x3a4] ss:$16 sps:$4 sm:$0xff]   ;;  %v2666_v45 = vld [vmem:[%s3280_s20 + $0x3a0] ss:$16 sps:$4 sm:$0xff]  }
  0x75   : > { %1816 = vmatpush1.bf16.msra.mxu0 %v2635_v24  ;;  %v2667_v46 = vld [vmem:[%s3280_s20 + $0x184] ss:$16 sps:$4 sm:$0xff]   ;;  %v2671_v51 = vld [vmem:[%s3280_s20 + $0x180] ss:$16 sps:$4 sm:$0xff]  }
  0x76   : > { %1857 = vmatpush1.bf16.msra.mxu1 %v2636_v25  ;;  %1817 = vmatprep.subr.bf16.mxu0 %v2637_v26  ;;  %v2669_v47 = vld [vmem:[%s3280_s20 + $0x384] ss:$16 sps:$4 sm:$0xff]   ;;  %v2672_v52 = vld [vmem:[%s3280_s20 + $0x380] ss:$16 sps:$4 sm:$0xff]  }
  0x77   : > { %1858 = vmatprep.subr.bf16.mxu1 %v2639_v27  ;;  %v237_v48 = vld [vmem:[#allocation4] sm:$0xff] }
  0x78   : > { %v3338_v49 = vcombine.high %v237_v48, %v237_v48  ;;  %v2673_v54 = vld [vmem:[%s3280_s20 + $0x164] ss:$16 sps:$4 sm:$0xff]   ;;  %v2677_v56 = vld [vmem:[%s3280_s20 + $0x160] ss:$16 sps:$4 sm:$0xff]   ;;  %v3364_v8 = vcombine.low %v237_v48, %v237_v48 }
  0x79   : > { %1818 = vmatpush1.bf16.msra.mxu0 %v2641_v28  ;;  %v2675_v55 = vld [vmem:[%s3280_s20 + $0x364] ss:$16 sps:$4 sm:$0xff]   ;;  %v2678_v57 = vld [vmem:[%s3280_s20 + $0x360] ss:$16 sps:$4 sm:$0xff]  }
  0x7a   : > { %1859 = vmatpush1.bf16.msra.mxu1 %v2642_v29  ;;  %1819 = vmatprep.subr.bf16.mxu0 %v2643_v30  ;;  %v2679_v58 = vld [vmem:[%s3280_s20 + $0x144] ss:$16 sps:$4 sm:$0xff]   ;;  %v2683_v60 = vld [vmem:[%s3280_s20 + $0x140] ss:$16 sps:$4 sm:$0xff]  }
  0x7b   : > { %1860 = vmatprep.subr.bf16.mxu1 %v2645_v31  ;;  %1837 = vmatprep.mubr.bf16.mxu0 %v3338_v49  ;;  %v2681_v59 = vld [vmem:[%s3280_s20 + $0x344] ss:$16 sps:$4 sm:$0xff]   ;;  %v2684_v61 = vld [vmem:[%s3280_s20 + $0x340] ss:$16 sps:$4 sm:$0xff]  }
  0x7c   : > { %v2685_v62 = vld [vmem:[%s3280_s20 + $0x124] ss:$16 sps:$4 sm:$0xff]   ;;  %v2689_v0 = vld [vmem:[%s3280_s20 + $0x120] ss:$16 sps:$4 sm:$0xff]  }
  0x7d   : > { %1820 = vmatpush1.bf16.msra.mxu0 %v2647_v32  ;;  %v2687_v63 = vld [vmem:[%s3280_s20 + $0x324] ss:$16 sps:$4 sm:$0xff]   ;;  %v2690_v1 = vld [vmem:[%s3280_s20 + $0x320] ss:$16 sps:$4 sm:$0xff]  }
  0x7e   : > { %1861 = vmatpush1.bf16.msra.mxu1 %v2648_v33  ;;  %1821 = vmatprep.subr.bf16.mxu0 %v2649_v34  ;;  %v2691_v2 = vld [vmem:[%s3280_s20 + $0x104] ss:$16 sps:$4 sm:$0xff]   ;;  %v2695_v4 = vld [vmem:[%s3280_s20 + $0x100] ss:$16 sps:$4 sm:$0xff]  }
  0x7f   : > { %1862 = vmatprep.subr.bf16.mxu1 %v2651_v35  ;;  %v2693_v3 = vld [vmem:[%s3280_s20 + $0x304] ss:$16 sps:$4 sm:$0xff]   ;;  %v2696_v5 = vld [vmem:[%s3280_s20 + $0x300] ss:$16 sps:$4 sm:$0xff]   ;;  %v3396_v35 = vld [vmem:[#allocation4 + $0x18] sm:$0xff] }
  0x80   : > { %v2703_v6 = vld [vmem:[%s3280_s20 + $0x4e4] ss:$16 sps:$4 sm:$0xff]   ;;  %v2701_v10 = vld [vmem:[%s3280_s20 + $0x4e0] ss:$16 sps:$4 sm:$0xff]  }
  0x81   : > { %1822 = vmatpush2.bf16.msra.mxu0 %v2653_v36  ;;  %v2706_v7 = vld [vmem:[%s3280_s20 + $0x6e4] ss:$16 sps:$4 sm:$0xff]   ;;  %v2704_v11 = vld [vmem:[%s3280_s20 + $0x6e0] ss:$16 sps:$4 sm:$0xff]  }
  0x82   : > { %1863 = vmatpush2.bf16.msra.mxu1 %v2654_v37  ;;  %1823 = vmatprep.subr.bf16.mxu0 %v2655_v38  ;;  %v2709_v12 = vld [vmem:[%s3280_s20 + $0x4c4] ss:$16 sps:$4 sm:$0xff]   ;;  %v2707_v14 = vld [vmem:[%s3280_s20 + $0x4c0] ss:$16 sps:$4 sm:$0xff]  }
  0x83   : > { %1864 = vmatprep.subr.bf16.mxu1 %v2657_v39  ;;  %v2712_v13 = vld [vmem:[%s3280_s20 + $0x6c4] ss:$16 sps:$4 sm:$0xff]   ;;  %v2710_v15 = vld [vmem:[%s3280_s20 + $0x6c0] ss:$16 sps:$4 sm:$0xff]   ;;  %v3406_v39 = vcombine.high %v3396_v35, %v3396_v35 }
  0x84   : > { %v2715_v16 = vld [vmem:[%s3280_s20 + $0x4a4] ss:$16 sps:$4 sm:$0xff]   ;;  %v2713_v18 = vld [vmem:[%s3280_s20 + $0x4a0] ss:$16 sps:$4 sm:$0xff]  }
  0x85   : > { %1824 = vmatpush2.bf16.msra.mxu0 %v2659_v40  ;;  %v2718_v17 = vld [vmem:[%s3280_s20 + $0x6a4] ss:$16 sps:$4 sm:$0xff]   ;;  %v2716_v19 = vld [vmem:[%s3280_s20 + $0x6a0] ss:$16 sps:$4 sm:$0xff]  }
  0x86   : > { %1865 = vmatpush2.bf16.msra.mxu1 %v2660_v41  ;;  %1825 = vmatprep.subr.bf16.mxu0 %v2661_v42  ;;  %v2721_v20 = vld [vmem:[%s3280_s20 + $0x484] ss:$16 sps:$4 sm:$0xff]   ;;  %v2719_v22 = vld [vmem:[%s3280_s20 + $0x480] ss:$16 sps:$4 sm:$0xff]  }
  0x87   : > { %1866 = vmatprep.subr.bf16.mxu1 %v2663_v43  ;;  %v2724_v21 = vld [vmem:[%s3280_s20 + $0x684] ss:$16 sps:$4 sm:$0xff]   ;;  %v2722_v23 = vld [vmem:[%s3280_s20 + $0x680] ss:$16 sps:$4 sm:$0xff]  }
  0x88   : > { %v2727_v24 = vld [vmem:[%s3280_s20 + $0x464] ss:$16 sps:$4 sm:$0xff]   ;;  %v2725_v26 = vld [vmem:[%s3280_s20 + $0x460] ss:$16 sps:$4 sm:$0xff]  }
  0x89   : > { %1826 = vmatpush2.bf16.msra.mxu0 %v2665_v44  ;;  %v2730_v25 = vld [vmem:[%s3280_s20 + $0x664] ss:$16 sps:$4 sm:$0xff]   ;;  %v2728_v27 = vld [vmem:[%s3280_s20 + $0x660] ss:$16 sps:$4 sm:$0xff]  }
  0x8a   : > { %1867 = vmatpush2.bf16.msra.mxu1 %v2666_v45  ;;  %1827 = vmatprep.subr.bf16.mxu0 %v2667_v46  ;;  %v2733_v28 = vld [vmem:[%s3280_s20 + $0x444] ss:$16 sps:$4 sm:$0xff]   ;;  %v2731_v30 = vld [vmem:[%s3280_s20 + $0x440] ss:$16 sps:$4 sm:$0xff]  }
  0x8b   : > { %1868 = vmatprep.subr.bf16.mxu1 %v2669_v47  ;;  %v2736_v29 = vld [vmem:[%s3280_s20 + $0x644] ss:$16 sps:$4 sm:$0xff]   ;;  %v2734_v31 = vld [vmem:[%s3280_s20 + $0x640] ss:$16 sps:$4 sm:$0xff]  }
  0x8c   : > { %v2739_v32 = vld [vmem:[%s3280_s20 + $0x424] ss:$16 sps:$4 sm:$0xff]   ;;  %v2737_v36 = vld [vmem:[%s3280_s20 + $0x420] ss:$16 sps:$4 sm:$0xff]  }
  0x8d   : > { %1828 = vmatpush2.bf16.msra.mxu0 %v2671_v51  ;;  %v2742_v33 = vld [vmem:[%s3280_s20 + $0x624] ss:$16 sps:$4 sm:$0xff]   ;;  %v2740_v37 = vld [vmem:[%s3280_s20 + $0x620] ss:$16 sps:$4 sm:$0xff]  }
  0x8e   : > { %1869 = vmatpush2.bf16.msra.mxu1 %v2672_v52  ;;  %1829 = vmatprep.subr.bf16.mxu0 %v2673_v54  ;;  %v3394_v34 = vld [vmem:[#allocation4 + $0x10] sm:$0xff] }
  0x8f   : > { %1870 = vmatprep.subr.bf16.mxu1 %v2675_v55  ;;  %v3402_v38 = vcombine.high %v3394_v34, %v3394_v34  ;;  %v2745_v40 = vld [vmem:[%s3280_s20 + $0x404] ss:$16 sps:$4 sm:$0xff]   ;;  %v2743_v42 = vld [vmem:[%s3280_s20 + $0x400] ss:$16 sps:$4 sm:$0xff]  }
  0x90   : > { %v2748_v41 = vld [vmem:[%s3280_s20 + $0x604] ss:$16 sps:$4 sm:$0xff]   ;;  %v2746_v43 = vld [vmem:[%s3280_s20 + $0x600] ss:$16 sps:$4 sm:$0xff]  }
  0x91   : > { %1830 = vmatpush2.bf16.msra.mxu0 %v2677_v56  ;;  %v2751_v44 = vld [vmem:[%s3280_s20 + $0x5e4] ss:$16 sps:$4 sm:$0xff]   ;;  %v2749_v46 = vld [vmem:[%s3280_s20 + $0x5e0] ss:$16 sps:$4 sm:$0xff]  }
  0x92   : > { %1871 = vmatpush2.bf16.msra.mxu1 %v2678_v57  ;;  %1831 = vmatprep.subr.bf16.mxu0 %v2679_v58  ;;  %v2754_v45 = vld [vmem:[%s3280_s20 + $0x7e4] ss:$16 sps:$4 sm:$0xff]   ;;  %v2752_v47 = vld [vmem:[%s3280_s20 + $0x7e0] ss:$16 sps:$4 sm:$0xff]  }
  0x93   : > { %1872 = vmatprep.subr.bf16.mxu1 %v2681_v59  ;;  %v2757_v48 = vld [vmem:[%s3280_s20 + $0x5c4] ss:$16 sps:$4 sm:$0xff]   ;;  %v2755_v51 = vld [vmem:[%s3280_s20 + $0x5c0] ss:$16 sps:$4 sm:$0xff]  }
  0x94   : > { %v2760_v50 = vld [vmem:[%s3280_s20 + $0x7c4] ss:$16 sps:$4 sm:$0xff]   ;;  %v2758_v52 = vld [vmem:[%s3280_s20 + $0x7c0] ss:$16 sps:$4 sm:$0xff]  }
  0x95   : > { %1832 = vmatpush2.bf16.msra.mxu0 %v2683_v60  ;;  %v2763_v54 = vld [vmem:[%s3280_s20 + $0x5a4] ss:$16 sps:$4 sm:$0xff]   ;;  %v2761_v56 = vld [vmem:[%s3280_s20 + $0x5a0] ss:$16 sps:$4 sm:$0xff]  }
  0x96   : > { %1873 = vmatpush2.bf16.msra.mxu1 %v2684_v61  ;;  %1833 = vmatprep.subr.bf16.mxu0 %v2685_v62  ;;  %v2766_v55 = vld [vmem:[%s3280_s20 + $0x7a4] ss:$16 sps:$4 sm:$0xff]   ;;  %v2764_v57 = vld [vmem:[%s3280_s20 + $0x7a0] ss:$16 sps:$4 sm:$0xff]  }
  0x97   : > { %1874 = vmatprep.subr.bf16.mxu1 %v2687_v63  ;;  %v2769_v58 = vld [vmem:[%s3280_s20 + $0x584] ss:$16 sps:$4 sm:$0xff]   ;;  %v2767_v60 = vld [vmem:[%s3280_s20 + $0x580] ss:$16 sps:$4 sm:$0xff]  }
  0x98   : > { %v2772_v59 = vld [vmem:[%s3280_s20 + $0x784] ss:$16 sps:$4 sm:$0xff]   ;;  %v2770_v61 = vld [vmem:[%s3280_s20 + $0x780] ss:$16 sps:$4 sm:$0xff]  }
  0x99   : > { %1834 = vmatpush2.bf16.msra.mxu0 %v2689_v0  ;;  %v2775_v62 = vld [vmem:[%s3280_s20 + $0x564] ss:$16 sps:$4 sm:$0xff]   ;;  %v2773_v0 = vld [vmem:[%s3280_s20 + $0x560] ss:$16 sps:$4 sm:$0xff]  }
  0x9a   : > { %1875 = vmatpush2.bf16.msra.mxu1 %v2690_v1  ;;  %1835 = vmatprep.subr.bf16.mxu0 %v2691_v2  ;;  %v2778_v63 = vld [vmem:[%s3280_s20 + $0x764] ss:$16 sps:$4 sm:$0xff]   ;;  %v2776_v1 = vld [vmem:[%s3280_s20 + $0x760] ss:$16 sps:$4 sm:$0xff]  }
  0x9b   : > { %1876 = vmatprep.subr.bf16.mxu1 %v2693_v3  ;;  %v2781_v2 = vld [vmem:[%s3280_s20 + $0x544] ss:$16 sps:$4 sm:$0xff]  }
  0x9c   : > { %v2784_v3 = vld [vmem:[%s3280_s20 + $0x744] ss:$16 sps:$4 sm:$0xff]  }
  0x9d   : > { %1836 = vmatpush2.bf16.msra.mxu0 %v2695_v4  ;;  %v2779_v4 = vld [vmem:[%s3280_s20 + $0x540] ss:$16 sps:$4 sm:$0xff]  }
  0x9e   : > { %1877 = vmatpush2.bf16.msra.mxu1 %v2696_v5  ;;  %1887 = vmatprep.subr.bf16.mxu0 %v2703_v6  ;;  %v2782_v5 = vld [vmem:[%s3280_s20 + $0x740] ss:$16 sps:$4 sm:$0xff]   ;;  %v2787_v6 = vld [vmem:[%s3280_s20 + $0x524] ss:$16 sps:$4 sm:$0xff]  }
  0x9f   : > { %1928 = vmatprep.subr.bf16.mxu1 %v2706_v7  ;;  %v2790_v7 = vld [vmem:[%s3280_s20 + $0x724] ss:$16 sps:$4 sm:$0xff]  }
  0xa0   : > { %1838 = vmatmul.mubr.bf16.vlgmr.msra.gmra.mxu0 %v3364_v8 }
  0xa1   : > { %1879 = vmatmul.mubr.bf16.vlgmr.msra.gmra.mxu1 %v3366_v9  ;;  %1888 = vmatpush1.bf16.msra.mxu0 %v2701_v10  ;;  %v2785_v10 = vld [vmem:[%s3280_s20 + $0x520] ss:$16 sps:$4 sm:$0xff]  }
  0xa2   : > { %1929 = vmatpush1.bf16.msra.mxu1 %v2704_v11  ;;  %1889 = vmatprep.subr.bf16.mxu0 %v2709_v12  ;;  %v2788_v11 = vld [vmem:[%s3280_s20 + $0x720] ss:$16 sps:$4 sm:$0xff]   ;;  %v2793_v12 = vld [vmem:[%s3280_s20 + $0x504] ss:$16 sps:$4 sm:$0xff]  }
  0xa3   : > { %1930 = vmatprep.subr.bf16.mxu1 %v2712_v13  ;;  %1919 = vmatprep.mubr.bf16.mxu0 %v3402_v38  ;;  %v2796_v13 = vld [vmem:[%s3280_s20 + $0x704] ss:$16 sps:$4 sm:$0xff]  }
  0xa4   : > { %1960 = vmatprep.mubr.bf16.mxu1 %v3406_v39 }
  0xa5   : > { %1890 = vmatpush1.bf16.msra.mxu0 %v2707_v14  ;;  %v2791_v14 = vld [vmem:[%s3280_s20 + $0x500] ss:$16 sps:$4 sm:$0xff]  }
  0xa6   : > { %1931 = vmatpush1.bf16.msra.mxu1 %v2710_v15  ;;  %1891 = vmatprep.subr.bf16.mxu0 %v2715_v16  ;;  %v2794_v15 = vld [vmem:[%s3280_s20 + $0x700] ss:$16 sps:$4 sm:$0xff]   ;;  %v2803_v16 = vld [vmem:[%s3280_s20 + $0xec] ss:$16 sps:$4 sm:$0xff]  }
  0xa7   : > { %1932 = vmatprep.subr.bf16.mxu1 %v2718_v17  ;;  %v2806_v17 = vld [vmem:[%s3280_s20 + $0x2ec] ss:$16 sps:$4 sm:$0xff]  }
  0xa9   : > { %1892 = vmatpush1.bf16.msra.mxu0 %v2713_v18  ;;  %v3450_v18 = vcombine.low %v3394_v34, %v3394_v34  ;;  %v2825_v34 = vld [vmem:[%s3280_s20 + $0x68] ss:$16 sps:$4 sm:$0xff]  }
  0xaa   : > { %1933 = vmatpush1.bf16.msra.mxu1 %v2716_v19  ;;  %1893 = vmatprep.subr.bf16.mxu0 %v2721_v20  ;;  %v3454_v19 = vcombine.low %v3396_v35, %v3396_v35  ;;  %v2801_v20 = vld [vmem:[%s3280_s20 + $0xe8] ss:$16 sps:$4 sm:$0xff]  }
  0xab   : > { %1934 = vmatprep.subr.bf16.mxu1 %v2724_v21  ;;  %v2804_v21 = vld [vmem:[%s3280_s20 + $0x2e8] ss:$16 sps:$4 sm:$0xff]  }
  0xac   : > { %v2828_v35 = vld [vmem:[%s3280_s20 + $0x268] ss:$16 sps:$4 sm:$0xff]  }
  0xad   : > { %1894 = vmatpush1.bf16.msra.mxu0 %v2719_v22  ;;  %v2809_v22 = vld [vmem:[%s3280_s20 + $0xcc] ss:$16 sps:$4 sm:$0xff]  }
  0xae   : > { %1935 = vmatpush1.bf16.msra.mxu1 %v2722_v23  ;;  %1895 = vmatprep.subr.bf16.mxu0 %v2727_v24  ;;  %v2812_v23 = vld [vmem:[%s3280_s20 + $0x2cc] ss:$16 sps:$4 sm:$0xff]   ;;  %v2807_v24 = vld [vmem:[%s3280_s20 + $0xc8] ss:$16 sps:$4 sm:$0xff]  }
  0xaf   : > { %1936 = vmatprep.subr.bf16.mxu1 %v2730_v25  ;;  %v2810_v25 = vld [vmem:[%s3280_s20 + $0x2c8] ss:$16 sps:$4 sm:$0xff]  }
  0xb1   : > { %1896 = vmatpush1.bf16.msra.mxu0 %v2725_v26  ;;  %v2815_v26 = vld [vmem:[%s3280_s20 + $0xac] ss:$16 sps:$4 sm:$0xff]  }
  0xb2   : > { %1937 = vmatpush1.bf16.msra.mxu1 %v2728_v27  ;;  %1897 = vmatprep.subr.bf16.mxu0 %v2733_v28  ;;  %v2818_v27 = vld [vmem:[%s3280_s20 + $0x2ac] ss:$16 sps:$4 sm:$0xff]   ;;  %v2813_v28 = vld [vmem:[%s3280_s20 + $0xa8] ss:$16 sps:$4 sm:$0xff]  }
  0xb3   : > { %1938 = vmatprep.subr.bf16.mxu1 %v2736_v29  ;;  %v2816_v29 = vld [vmem:[%s3280_s20 + $0x2a8] ss:$16 sps:$4 sm:$0xff]  }
  0xb5   : > { %1898 = vmatpush1.bf16.msra.mxu0 %v2731_v30  ;;  %v2821_v30 = vld [vmem:[%s3280_s20 + $0x8c] ss:$16 sps:$4 sm:$0xff]  }
  0xb6   : > { %1939 = vmatpush1.bf16.msra.mxu1 %v2734_v31  ;;  %1899 = vmatprep.subr.bf16.mxu0 %v2739_v32  ;;  %v2824_v31 = vld [vmem:[%s3280_s20 + $0x28c] ss:$16 sps:$4 sm:$0xff]   ;;  %v2819_v32 = vld [vmem:[%s3280_s20 + $0x88] ss:$16 sps:$4 sm:$0xff]  }
  0xb7   : > { %1940 = vmatprep.subr.bf16.mxu1 %v2742_v33  ;;  %v2822_v33 = vld [vmem:[%s3280_s20 + $0x288] ss:$16 sps:$4 sm:$0xff]  }
  0xb9   : > { %1900 = vmatpush1.bf16.msra.mxu0 %v2737_v36  ;;  %v2833_v36 = vld [vmem:[%s3280_s20 + $0x4c] ss:$16 sps:$4 sm:$0xff]  }
  0xba   : > { %1941 = vmatpush1.bf16.msra.mxu1 %v2740_v37  ;;  %1901 = vmatprep.subr.bf16.mxu0 %v2745_v40  ;;  %v2836_v37 = vld [vmem:[%s3280_s20 + $0x24c] ss:$16 sps:$4 sm:$0xff]   ;;  %v2831_v40 = vld [vmem:[%s3280_s20 + $0x48] ss:$16 sps:$4 sm:$0xff]  }
  0xbb   : > { %1942 = vmatprep.subr.bf16.mxu1 %v2748_v41  ;;  %v2834_v41 = vld [vmem:[%s3280_s20 + $0x248] ss:$16 sps:$4 sm:$0xff]  }
  0xbd   : > { %1902 = vmatpush1.bf16.msra.mxu0 %v2743_v42  ;;  %v2839_v42 = vld [vmem:[%s3280_s20 + $0x2c] ss:$16 sps:$4 sm:$0xff]  }
  0xbe   : > { %1943 = vmatpush1.bf16.msra.mxu1 %v2746_v43  ;;  %1903 = vmatprep.subr.bf16.mxu0 %v2751_v44  ;;  %v2842_v43 = vld [vmem:[%s3280_s20 + $0x22c] ss:$16 sps:$4 sm:$0xff]   ;;  %v2837_v44 = vld [vmem:[%s3280_s20 + $0x28] ss:$16 sps:$4 sm:$0xff]  }
  0xbf   : > { %1944 = vmatprep.subr.bf16.mxu1 %v2754_v45  ;;  %v2840_v45 = vld [vmem:[%s3280_s20 + $0x228] ss:$16 sps:$4 sm:$0xff]  }
  0xc1   : > { %1904 = vmatpush2.bf16.msra.mxu0 %v2749_v46  ;;  %v2845_v46 = vld [vmem:[%s3280_s20 + $0xc] ss:$16 sps:$4 sm:$0xff]  }
  0xc2   : > { %1945 = vmatpush2.bf16.msra.mxu1 %v2752_v47  ;;  %1905 = vmatprep.subr.bf16.mxu0 %v2757_v48  ;;  %v2848_v47 = vld [vmem:[%s3280_s20 + $0x20c] ss:$16 sps:$4 sm:$0xff]   ;;  %v2843_v48 = vld [vmem:[%s3280_s20 + $0x8] ss:$16 sps:$4 sm:$0xff]  }
  0xc3   : > { %1946 = vmatprep.subr.bf16.mxu1 %v2760_v50  ;;  %v2846_v50 = vld [vmem:[%s3280_s20 + $0x208] ss:$16 sps:$4 sm:$0xff]  }
  0xc5   : > { %1906 = vmatpush2.bf16.msra.mxu0 %v2755_v51  ;;  %v2851_v51 = vld [vmem:[%s3280_s20 + $0x1ec] ss:$16 sps:$4 sm:$0xff]  }
  0xc6   : > { %1947 = vmatpush2.bf16.msra.mxu1 %v2758_v52  ;;  %1907 = vmatprep.subr.bf16.mxu0 %v2763_v54  ;;  %v2854_v52 = vld [vmem:[%s3280_s20 + $0x3ec] ss:$16 sps:$4 sm:$0xff]   ;;  %v2849_v54 = vld [vmem:[%s3280_s20 + $0x1e8] ss:$16 sps:$4 sm:$0xff]  }
  0xc7   : > { %1948 = vmatprep.subr.bf16.mxu1 %v2766_v55  ;;  %v2852_v55 = vld [vmem:[%s3280_s20 + $0x3e8] ss:$16 sps:$4 sm:$0xff]  }
  0xc9   : > { %1908 = vmatpush2.bf16.msra.mxu0 %v2761_v56  ;;  %v2857_v56 = vld [vmem:[%s3280_s20 + $0x1cc] ss:$16 sps:$4 sm:$0xff]  }
  0xca   : > { %1949 = vmatpush2.bf16.msra.mxu1 %v2764_v57  ;;  %1909 = vmatprep.subr.bf16.mxu0 %v2769_v58  ;;  %v2860_v57 = vld [vmem:[%s3280_s20 + $0x3cc] ss:$16 sps:$4 sm:$0xff]   ;;  %v2855_v58 = vld [vmem:[%s3280_s20 + $0x1c8] ss:$16 sps:$4 sm:$0xff]  }
  0xcb   : > { %1950 = vmatprep.subr.bf16.mxu1 %v2772_v59  ;;  %v2858_v59 = vld [vmem:[%s3280_s20 + $0x3c8] ss:$16 sps:$4 sm:$0xff]  }
  0xcd   : > { %1910 = vmatpush2.bf16.msra.mxu0 %v2767_v60  ;;  %v2863_v60 = vld [vmem:[%s3280_s20 + $0x1ac] ss:$16 sps:$4 sm:$0xff]  }
  0xce   : > { %1951 = vmatpush2.bf16.msra.mxu1 %v2770_v61  ;;  %1911 = vmatprep.subr.bf16.mxu0 %v2775_v62  ;;  %v2866_v61 = vld [vmem:[%s3280_s20 + $0x3ac] ss:$16 sps:$4 sm:$0xff]   ;;  %v2861_v62 = vld [vmem:[%s3280_s20 + $0x1a8] ss:$16 sps:$4 sm:$0xff]  }
  0xcf   : > { %1952 = vmatprep.subr.bf16.mxu1 %v2778_v63  ;;  %v2864_v63 = vld [vmem:[%s3280_s20 + $0x3a8] ss:$16 sps:$4 sm:$0xff]  }
  0xd1   : > { %1912 = vmatpush2.bf16.msra.mxu0 %v2773_v0  ;;  %v2869_v0 = vld [vmem:[%s3280_s20 + $0x18c] ss:$16 sps:$4 sm:$0xff]  }
  0xd2   : > { %1953 = vmatpush2.bf16.msra.mxu1 %v2776_v1  ;;  %1913 = vmatprep.subr.bf16.mxu0 %v2781_v2  ;;  %v2872_v1 = vld [vmem:[%s3280_s20 + $0x38c] ss:$16 sps:$4 sm:$0xff]   ;;  %v2867_v2 = vld [vmem:[%s3280_s20 + $0x188] ss:$16 sps:$4 sm:$0xff]  }
  0xd3   : > { %1954 = vmatprep.subr.bf16.mxu1 %v2784_v3  ;;  %v2870_v3 = vld [vmem:[%s3280_s20 + $0x388] ss:$16 sps:$4 sm:$0xff]  }
  0xd5   : > { %1914 = vmatpush2.bf16.msra.mxu0 %v2779_v4  ;;  %v2875_v4 = vld [vmem:[%s3280_s20 + $0x16c] ss:$16 sps:$4 sm:$0xff]  }
  0xd6   : > { %1955 = vmatpush2.bf16.msra.mxu1 %v2782_v5  ;;  %1915 = vmatprep.subr.bf16.mxu0 %v2787_v6  ;;  %v2878_v5 = vld [vmem:[%s3280_s20 + $0x36c] ss:$16 sps:$4 sm:$0xff]   ;;  %v2873_v6 = vld [vmem:[%s3280_s20 + $0x168] ss:$16 sps:$4 sm:$0xff]  }
  0xd7   : > { %1956 = vmatprep.subr.bf16.mxu1 %v2790_v7  ;;  %v2876_v7 = vld [vmem:[%s3280_s20 + $0x368] ss:$16 sps:$4 sm:$0xff]  }
  0xd9   : > { %1916 = vmatpush2.bf16.msra.mxu0 %v2785_v10  ;;  %v2881_v10 = vld [vmem:[%s3280_s20 + $0x14c] ss:$16 sps:$4 sm:$0xff]  }
  0xda   : > { %1957 = vmatpush2.bf16.msra.mxu1 %v2788_v11  ;;  %1917 = vmatprep.subr.bf16.mxu0 %v2793_v12  ;;  %v2884_v11 = vld [vmem:[%s3280_s20 + $0x34c] ss:$16 sps:$4 sm:$0xff]   ;;  %v2879_v12 = vld [vmem:[%s3280_s20 + $0x148] ss:$16 sps:$4 sm:$0xff]  }
  0xdb   : > { %1958 = vmatprep.subr.bf16.mxu1 %v2796_v13  ;;  %v2882_v13 = vld [vmem:[%s3280_s20 + $0x348] ss:$16 sps:$4 sm:$0xff]  }
  0xdd   : > { %1918 = vmatpush2.bf16.msra.mxu0 %v2791_v14  ;;  %v2887_v14 = vld [vmem:[%s3280_s20 + $0x12c] ss:$16 sps:$4 sm:$0xff]  }
  0xde   : > { %1959 = vmatpush2.bf16.msra.mxu1 %v2794_v15  ;;  %1969 = vmatprep.subr.bf16.mxu0 %v2803_v16  ;;  %v2890_v15 = vld [vmem:[%s3280_s20 + $0x32c] ss:$16 sps:$4 sm:$0xff]   ;;  %v2885_v16 = vld [vmem:[%s3280_s20 + $0x128] ss:$16 sps:$4 sm:$0xff]  }
  0xdf   : > { %2010 = vmatprep.subr.bf16.mxu1 %v2806_v17  ;;  %v2888_v17 = vld [vmem:[%s3280_s20 + $0x328] ss:$16 sps:$4 sm:$0xff]  }
  0xe0   : > { %1920 = vmatmul.mubr.bf16.vlgmr.msra.gmra.mxu0 %v3450_v18 }
  0xe1   : > { %1961 = vmatmul.mubr.bf16.vlgmr.msra.gmra.mxu1 %v3454_v19  ;;  %1970 = vmatpush1.bf16.msra.mxu0 %v2801_v20  ;;  %v2893_v20 = vld [vmem:[%s3280_s20 + $0x10c] ss:$16 sps:$4 sm:$0xff]  }
  0xe2   : > { %2011 = vmatpush1.bf16.msra.mxu1 %v2804_v21  ;;  %1971 = vmatprep.subr.bf16.mxu0 %v2809_v22  ;;  %v2896_v21 = vld [vmem:[%s3280_s20 + $0x30c] ss:$16 sps:$4 sm:$0xff]   ;;  %v2891_v22 = vld [vmem:[%s3280_s20 + $0x108] ss:$16 sps:$4 sm:$0xff]  }
  0xe3   : > { %2012 = vmatprep.subr.bf16.mxu1 %v2812_v23  ;;  %2001 = vmatprep.mubr.bf16.mxu0 %v3338_v49  ;;  %v2827_v49 = vld [vmem:[%s3280_s20 + $0x6c] ss:$16 sps:$4 sm:$0xff]   ;;  %v2894_v23 = vld [vmem:[%s3280_s20 + $0x308] ss:$16 sps:$4 sm:$0xff]  }
  0xe4   : > { %2042 = vmatprep.mubr.bf16.mxu1 %v3342_v53  ;;  %v2830_v53 = vld [vmem:[%s3280_s20 + $0x26c] ss:$16 sps:$4 sm:$0xff]  }
  0xe5   : > { %1972 = vmatpush1.bf16.msra.mxu0 %v2807_v24  ;;  %v2899_v24 = vld [vmem:[%s3280_s20 + $0x4ec] ss:$16 sps:$4 sm:$0xff]  }
  0xe6   : > { %2013 = vmatpush1.bf16.msra.mxu1 %v2810_v25  ;;  %1973 = vmatprep.subr.bf16.mxu0 %v2815_v26  ;;  %v2902_v25 = vld [vmem:[%s3280_s20 + $0x6ec] ss:$16 sps:$4 sm:$0xff]   ;;  %v2897_v26 = vld [vmem:[%s3280_s20 + $0x4e8] ss:$16 sps:$4 sm:$0xff]  }
  0xe7   : > { %2014 = vmatprep.subr.bf16.mxu1 %v2818_v27  ;;  %v2900_v27 = vld [vmem:[%s3280_s20 + $0x6e8] ss:$16 sps:$4 sm:$0xff]  }
  0xe9   : > { %1974 = vmatpush1.bf16.msra.mxu0 %v2813_v28  ;;  %v2905_v28 = vld [vmem:[%s3280_s20 + $0x4cc] ss:$16 sps:$4 sm:$0xff]  }
  0xea   : > { %2015 = vmatpush1.bf16.msra.mxu1 %v2816_v29  ;;  %1975 = vmatprep.subr.bf16.mxu0 %v2821_v30  ;;  %v2908_v29 = vld [vmem:[%s3280_s20 + $0x6cc] ss:$16 sps:$4 sm:$0xff]   ;;  %v2903_v30 = vld [vmem:[%s3280_s20 + $0x4c8] ss:$16 sps:$4 sm:$0xff]  }
  0xeb   : > { %2016 = vmatprep.subr.bf16.mxu1 %v2824_v31  ;;  %v2906_v31 = vld [vmem:[%s3280_s20 + $0x6c8] ss:$16 sps:$4 sm:$0xff]  }
  0xed   : > { %1976 = vmatpush1.bf16.msra.mxu0 %v2819_v32  ;;  %v2911_v32 = vld [vmem:[%s3280_s20 + $0x4ac] ss:$16 sps:$4 sm:$0xff]  }
  0xee   : > { %2017 = vmatpush1.bf16.msra.mxu1 %v2822_v33  ;;  %1977 = vmatprep.subr.bf16.mxu0 %v2827_v49  ;;  %v2914_v33 = vld [vmem:[%s3280_s20 + $0x6ac] ss:$16 sps:$4 sm:$0xff]  }
  0xef   : > { %2018 = vmatprep.subr.bf16.mxu1 %v2830_v53  ;;  %v2917_v49 = vld [vmem:[%s3280_s20 + $0x48c] ss:$16 sps:$4 sm:$0xff]  }
  0xf0   : > { %v2920_v53 = vld [vmem:[%s3280_s20 + $0x68c] ss:$16 sps:$4 sm:$0xff]  }
  0xf1   : > { %1978 = vmatpush1.bf16.msra.mxu0 %v2825_v34  ;;  %v2915_v34 = vld [vmem:[%s3280_s20 + $0x488] ss:$16 sps:$4 sm:$0xff]  }
  0xf2   : > { %2019 = vmatpush1.bf16.msra.mxu1 %v2828_v35  ;;  %1979 = vmatprep.subr.bf16.mxu0 %v2833_v36  ;;  %v2926_v35 = vld [vmem:[%s3280_s20 + $0x66c] ss:$16 sps:$4 sm:$0xff]   ;;  %v2921_v36 = vld [vmem:[%s3280_s20 + $0x468] ss:$16 sps:$4 sm:$0xff]  }
  0xf3   : > { %2020 = vmatprep.subr.bf16.mxu1 %v2836_v37  ;;  %v2924_v37 = vld [vmem:[%s3280_s20 + $0x668] ss:$16 sps:$4 sm:$0xff]  }
  0xf5   : > { %1980 = vmatpush1.bf16.msra.mxu0 %v2831_v40  ;;  %v2929_v40 = vld [vmem:[%s3280_s20 + $0x44c] ss:$16 sps:$4 sm:$0xff]  }
  0xf6   : > { %2021 = vmatpush1.bf16.msra.mxu1 %v2834_v41  ;;  %1981 = vmatprep.subr.bf16.mxu0 %v2839_v42  ;;  %v2932_v41 = vld [vmem:[%s3280_s20 + $0x64c] ss:$16 sps:$4 sm:$0xff]   ;;  %v2927_v42 = vld [vmem:[%s3280_s20 + $0x448] ss:$16 sps:$4 sm:$0xff]  }
  0xf7   : > { %2022 = vmatprep.subr.bf16.mxu1 %v2842_v43  ;;  %v2930_v43 = vld [vmem:[%s3280_s20 + $0x648] ss:$16 sps:$4 sm:$0xff]  }
  0xf9   : > { %1982 = vmatpush1.bf16.msra.mxu0 %v2837_v44  ;;  %v2935_v44 = vld [vmem:[%s3280_s20 + $0x42c] ss:$16 sps:$4 sm:$0xff]  }
  0xfa   : > { %2023 = vmatpush1.bf16.msra.mxu1 %v2840_v45  ;;  %1983 = vmatprep.subr.bf16.mxu0 %v2845_v46  ;;  %v2938_v45 = vld [vmem:[%s3280_s20 + $0x62c] ss:$16 sps:$4 sm:$0xff]   ;;  %v2933_v46 = vld [vmem:[%s3280_s20 + $0x428] ss:$16 sps:$4 sm:$0xff]  }
  0xfb   : > { %2024 = vmatprep.subr.bf16.mxu1 %v2848_v47  ;;  %v2936_v47 = vld [vmem:[%s3280_s20 + $0x628] ss:$16 sps:$4 sm:$0xff]  }
  0xfd   : > { %1984 = vmatpush1.bf16.msra.mxu0 %v2843_v48  ;;  %v2941_v48 = vld [vmem:[%s3280_s20 + $0x40c] ss:$16 sps:$4 sm:$0xff]  }
  0xfe   : > { %2025 = vmatpush1.bf16.msra.mxu1 %v2846_v50  ;;  %1985 = vmatprep.subr.bf16.mxu0 %v2851_v51  ;;  %v2944_v50 = vld [vmem:[%s3280_s20 + $0x60c] ss:$16 sps:$4 sm:$0xff]   ;;  %v2939_v51 = vld [vmem:[%s3280_s20 + $0x408] ss:$16 sps:$4 sm:$0xff]  }
  0xff   : > { %2026 = vmatprep.subr.bf16.mxu1 %v2854_v52  ;;  %v2942_v52 = vld [vmem:[%s3280_s20 + $0x608] ss:$16 sps:$4 sm:$0xff]  }
 0x101   : > { %1986 = vmatpush2.bf16.msra.mxu0 %v2849_v54  ;;  %v2947_v54 = vld [vmem:[%s3280_s20 + $0x5ec] ss:$16 sps:$4 sm:$0xff]  }
 0x102   : > { %2027 = vmatpush2.bf16.msra.mxu1 %v2852_v55  ;;  %1987 = vmatprep.subr.bf16.mxu0 %v2857_v56  ;;  %v2950_v55 = vld [vmem:[%s3280_s20 + $0x7ec] ss:$16 sps:$4 sm:$0xff]   ;;  %v2945_v56 = vld [vmem:[%s3280_s20 + $0x5e8] ss:$16 sps:$4 sm:$0xff]  }
 0x103   : > { %2028 = vmatprep.subr.bf16.mxu1 %v2860_v57  ;;  %v2948_v57 = vld [vmem:[%s3280_s20 + $0x7e8] ss:$16 sps:$4 sm:$0xff]  }
 0x105   : > { %1988 = vmatpush2.bf16.msra.mxu0 %v2855_v58  ;;  %v2953_v58 = vld [vmem:[%s3280_s20 + $0x5cc] ss:$16 sps:$4 sm:$0xff]  }
 0x106   : > { %2029 = vmatpush2.bf16.msra.mxu1 %v2858_v59  ;;  %1989 = vmatprep.subr.bf16.mxu0 %v2863_v60  ;;  %v2956_v59 = vld [vmem:[%s3280_s20 + $0x7cc] ss:$16 sps:$4 sm:$0xff]   ;;  %v2951_v60 = vld [vmem:[%s3280_s20 + $0x5c8] ss:$16 sps:$4 sm:$0xff]  }
 0x107   : > { %2030 = vmatprep.subr.bf16.mxu1 %v2866_v61  ;;  %v2954_v61 = vld [vmem:[%s3280_s20 + $0x7c8] ss:$16 sps:$4 sm:$0xff]  }
 0x109   : > { %1990 = vmatpush2.bf16.msra.mxu0 %v2861_v62  ;;  %v2959_v62 = vld [vmem:[%s3280_s20 + $0x5ac] ss:$16 sps:$4 sm:$0xff]  }
 0x10a   : > { %2031 = vmatpush2.bf16.msra.mxu1 %v2864_v63  ;;  %1991 = vmatprep.subr.bf16.mxu0 %v2869_v0  ;;  %v2962_v63 = vld [vmem:[%s3280_s20 + $0x7ac] ss:$16 sps:$4 sm:$0xff]   ;;  %v2957_v0 = vld [vmem:[%s3280_s20 + $0x5a8] ss:$16 sps:$4 sm:$0xff]  }
 0x10b   : > { %2032 = vmatprep.subr.bf16.mxu1 %v2872_v1  ;;  %v2960_v1 = vld [vmem:[%s3280_s20 + $0x7a8] ss:$16 sps:$4 sm:$0xff]  }
 0x10d   : > { %1992 = vmatpush2.bf16.msra.mxu0 %v2867_v2  ;;  %v2965_v2 = vld [vmem:[%s3280_s20 + $0x58c] ss:$16 sps:$4 sm:$0xff]  }
 0x10e   : > { %2033 = vmatpush2.bf16.msra.mxu1 %v2870_v3  ;;  %1993 = vmatprep.subr.bf16.mxu0 %v2875_v4  ;;  %v2968_v3 = vld [vmem:[%s3280_s20 + $0x78c] ss:$16 sps:$4 sm:$0xff]   ;;  %v2963_v4 = vld [vmem:[%s3280_s20 + $0x588] ss:$16 sps:$4 sm:$0xff]  }
 0x10f   : > { %2034 = vmatprep.subr.bf16.mxu1 %v2878_v5  ;;  %v2966_v5 = vld [vmem:[%s3280_s20 + $0x788] ss:$16 sps:$4 sm:$0xff]  }
 0x111   : > { %1994 = vmatpush2.bf16.msra.mxu0 %v2873_v6  ;;  %v2971_v6 = vld [vmem:[%s3280_s20 + $0x56c] ss:$16 sps:$4 sm:$0xff]  }
 0x112   : > { %2035 = vmatpush2.bf16.msra.mxu1 %v2876_v7  ;;  %1995 = vmatprep.subr.bf16.mxu0 %v2881_v10  ;;  %v2974_v7 = vld [vmem:[%s3280_s20 + $0x76c] ss:$16 sps:$4 sm:$0xff]   ;;  %v2969_v10 = vld [vmem:[%s3280_s20 + $0x568] ss:$16 sps:$4 sm:$0xff]  }
 0x113   : > { %2036 = vmatprep.subr.bf16.mxu1 %v2884_v11  ;;  %v2972_v11 = vld [vmem:[%s3280_s20 + $0x768] ss:$16 sps:$4 sm:$0xff]  }
 0x115   : > { %1996 = vmatpush2.bf16.msra.mxu0 %v2879_v12  ;;  %v2977_v12 = vld [vmem:[%s3280_s20 + $0x54c] ss:$16 sps:$4 sm:$0xff]  }
 0x116   : > { %2037 = vmatpush2.bf16.msra.mxu1 %v2882_v13  ;;  %1997 = vmatprep.subr.bf16.mxu0 %v2887_v14  ;;  %v2980_v13 = vld [vmem:[%s3280_s20 + $0x74c] ss:$16 sps:$4 sm:$0xff]   ;;  %v2975_v14 = vld [vmem:[%s3280_s20 + $0x548] ss:$16 sps:$4 sm:$0xff]  }
 0x117   : > { %2038 = vmatprep.subr.bf16.mxu1 %v2890_v15  ;;  %v2978_v15 = vld [vmem:[%s3280_s20 + $0x748] ss:$16 sps:$4 sm:$0xff]  }
 0x119   : > { %1998 = vmatpush2.bf16.msra.mxu0 %v2885_v16  ;;  %v2983_v16 = vld [vmem:[%s3280_s20 + $0x52c] ss:$16 sps:$4 sm:$0xff]  }
 0x11a   : > { %2039 = vmatpush2.bf16.msra.mxu1 %v2888_v17  ;;  %1999 = vmatprep.subr.bf16.mxu0 %v2893_v20  ;;  %v2986_v17 = vld [vmem:[%s3280_s20 + $0x72c] ss:$16 sps:$4 sm:$0xff]   ;;  %v2981_v20 = vld [vmem:[%s3280_s20 + $0x528] ss:$16 sps:$4 sm:$0xff]  }
 0x11b   : > { %2040 = vmatprep.subr.bf16.mxu1 %v2896_v21  ;;  %v2984_v21 = vld [vmem:[%s3280_s20 + $0x728] ss:$16 sps:$4 sm:$0xff]  }
 0x11d   : > { %2000 = vmatpush2.bf16.msra.mxu0 %v2891_v22  ;;  %v2989_v22 = vld [vmem:[%s3280_s20 + $0x50c] ss:$16 sps:$4 sm:$0xff]  }
 0x11e   : > { %2041 = vmatpush2.bf16.msra.mxu1 %v2894_v23  ;;  %2051 = vmatprep.subr.bf16.mxu0 %v2899_v24  ;;  %v2992_v23 = vld [vmem:[%s3280_s20 + $0x70c] ss:$16 sps:$4 sm:$0xff]   ;;  %v2987_v24 = vld [vmem:[%s3280_s20 + $0x508] ss:$16 sps:$4 sm:$0xff]  }
 0x11f   : > { %2092 = vmatprep.subr.bf16.mxu1 %v2902_v25  ;;  %v2990_v25 = vld [vmem:[%s3280_s20 + $0x708] ss:$16 sps:$4 sm:$0xff]  }
 0x120   : > { %2002 = vmatmul.mubr.bf16.vlgmr.msra.gmra.mxu0 %v3364_v8  ;;  %v2909_v8 = vld [vmem:[%s3280_s20 + $0x4a8] ss:$16 sps:$4 sm:$0xff]  }
 0x121   : > { %2043 = vmatmul.mubr.bf16.vlgmr.msra.gmra.mxu1 %v3366_v9  ;;  %2052 = vmatpush1.bf16.msra.mxu0 %v2897_v26  ;;  %v2912_v9 = vld [vmem:[%s3280_s20 + $0x6a8] ss:$16 sps:$4 sm:$0xff]  }
 0x122   : > { %2093 = vmatpush1.bf16.msra.mxu1 %v2900_v27  ;;  %2053 = vmatprep.subr.bf16.mxu0 %v2905_v28 }
 0x123   : > { %2094 = vmatprep.subr.bf16.mxu1 %v2908_v29  ;;  %2083 = vmatprep.mubr.bf16.mxu0 %v3402_v38  ;;  %v2918_v38 = vld [vmem:[%s3280_s20 + $0x688] ss:$16 sps:$4 sm:$0xff]  }
 0x124   : > { %2124 = vmatprep.mubr.bf16.mxu1 %v3406_v39  ;;  %v2923_v39 = vld [vmem:[%s3280_s20 + $0x46c] ss:$16 sps:$4 sm:$0xff]  }
 0x125   : > { %2054 = vmatpush1.bf16.msra.mxu0 %v2903_v30 }
 0x126   : > { %2095 = vmatpush1.bf16.msra.mxu1 %v2906_v31  ;;  %2055 = vmatprep.subr.bf16.mxu0 %v2911_v32 }
 0x127   : > { %2096 = vmatprep.subr.bf16.mxu1 %v2914_v33 }
 0x129   : > { %2056 = vmatpush1.bf16.msra.mxu0 %v2909_v8 }
 0x12a   : > { %2097 = vmatpush1.bf16.msra.mxu1 %v2912_v9  ;;  %2057 = vmatprep.subr.bf16.mxu0 %v2917_v49  ;;  %v2140_v49 = vlaneseq }
 0x12b   : > { %2098 = vmatprep.subr.bf16.mxu1 %v2920_v53 }
 0x12c   : > { %v2141_v53 = vshrl.u32 %v2140_v49, 7 }
 0x12d   : > { %2058 = vmatpush1.bf16.msra.mxu0 %v2915_v34 }
 0x12e   : > { %2099 = vmatpush1.bf16.msra.mxu1 %v2918_v38  ;;  %2059 = vmatprep.subr.bf16.mxu0 %v2923_v39  ;;  %v2142_v34 = vsub.s32 0, %v2141_v53  ;;  %v2146_v38 = vsub.s32 1, %v2141_v53 }
 0x12f   : > { %2100 = vmatprep.subr.bf16.mxu1 %v2926_v35 }
 0x131   : > { %2060 = vmatpush1.bf16.msra.mxu0 %v2921_v36 }
 0x132   : > { %2101 = vmatpush1.bf16.msra.mxu1 %v2924_v37  ;;  %2061 = vmatprep.subr.bf16.mxu0 %v2929_v40 }
 0x133   : > { %2102 = vmatprep.subr.bf16.mxu1 %v2932_v41 }
 0x135   : > { %2062 = vmatpush1.bf16.msra.mxu0 %v2927_v42 }
 0x136   : > { %2103 = vmatpush1.bf16.msra.mxu1 %v2930_v43  ;;  %2063 = vmatprep.subr.bf16.mxu0 %v2935_v44 }
 0x137   : > { %2104 = vmatprep.subr.bf16.mxu1 %v2938_v45 }
 0x139   : > { %2064 = vmatpush1.bf16.msra.mxu0 %v2933_v46 }
 0x13a   : > { %2105 = vmatpush1.bf16.msra.mxu1 %v2936_v47  ;;  %2065 = vmatprep.subr.bf16.mxu0 %v2941_v48 }
 0x13b   : > { %2106 = vmatprep.subr.bf16.mxu1 %v2944_v50 }
 0x13d   : > { %2066 = vmatpush1.bf16.msra.mxu0 %v2939_v51 }
 0x13e   : > { %2107 = vmatpush1.bf16.msra.mxu1 %v2942_v52  ;;  %2067 = vmatprep.subr.bf16.mxu0 %v2947_v54 }
 0x13f   : > { %2108 = vmatprep.subr.bf16.mxu1 %v2950_v55 }
 0x141   : > { %2068 = vmatpush2.bf16.msra.mxu0 %v2945_v56 }
 0x142   : > { %2109 = vmatpush2.bf16.msra.mxu1 %v2948_v57  ;;  %2069 = vmatprep.subr.bf16.mxu0 %v2953_v58 }
 0x143   : > { %2110 = vmatprep.subr.bf16.mxu1 %v2956_v59 }
 0x145   : > { %2070 = vmatpush2.bf16.msra.mxu0 %v2951_v60 }
 0x146   : > { %2111 = vmatpush2.bf16.msra.mxu1 %v2954_v61  ;;  %2071 = vmatprep.subr.bf16.mxu0 %v2959_v62  ;;  %v2150_v62 = vsub.s32 2, %v2141_v53 }
 0x147   : > { %2112 = vmatprep.subr.bf16.mxu1 %v2962_v63 }
 0x149   : > { %2072 = vmatpush2.bf16.msra.mxu0 %v2957_v0  ;;  %v2154_v0 = vsub.s32 3, %v2141_v53 }
 0x14a   : > { %2113 = vmatpush2.bf16.msra.mxu1 %v2960_v1  ;;  %2073 = vmatprep.subr.bf16.mxu0 %v2965_v2 }
 0x14b   : > { %2114 = vmatprep.subr.bf16.mxu1 %v2968_v3 }
 0x14d   : > { %2074 = vmatpush2.bf16.msra.mxu0 %v2963_v4 }
 0x14e   : > { %2115 = vmatpush2.bf16.msra.mxu1 %v2966_v5  ;;  %2075 = vmatprep.subr.bf16.mxu0 %v2971_v6 }
 0x14f   : > { %2116 = vmatprep.subr.bf16.mxu1 %v2974_v7 }
 0x151   : > { %2076 = vmatpush2.bf16.msra.mxu0 %v2969_v10 }
 0x152   : > { %2117 = vmatpush2.bf16.msra.mxu1 %v2972_v11  ;;  %2077 = vmatprep.subr.bf16.mxu0 %v2977_v12 }
 0x153   : > { %2118 = vmatprep.subr.bf16.mxu1 %v2980_v13 }
 0x155   : > { %2078 = vmatpush2.bf16.msra.mxu0 %v2975_v14 }
 0x156   : > { %2119 = vmatpush2.bf16.msra.mxu1 %v2978_v15  ;;  %2079 = vmatprep.subr.bf16.mxu0 %v2983_v16 }
 0x157   : > { %2120 = vmatprep.subr.bf16.mxu1 %v2986_v17 }
 0x159   : > { %2080 = vmatpush2.bf16.msra.mxu0 %v2981_v20 }
 0x15a   : > { %2121 = vmatpush2.bf16.msra.mxu1 %v2984_v21  ;;  %2081 = vmatprep.subr.bf16.mxu0 %v2989_v22 }
 0x15b   : > { %2122 = vmatprep.subr.bf16.mxu1 %v2992_v23 }
 0x15d   : > { %2082 = vmatpush2.bf16.msra.mxu0 %v2987_v24  ;;  %v2138_v24 = vld [vmem:[#allocation2] sm:$0xff] }
 0x15e   : > { %2123 = vmatpush2.bf16.msra.mxu1 %v2990_v25 }
 0x160   : > { %v1839_v26 = vpop.f32.mrf.mxu0  ;;  %2084 = vmatmul.mubr.bf16.vlgmr.msra.gmra.mxu0 %v3450_v18  ;;  %v2137_v18 = vld [vmem:[%s2136_s7] sm:$0xf] }
 0x161   : > { %v1880_v27 = vpop.f32.mrf.mxu1  ;;  %2125 = vmatmul.mubr.bf16.vlgmr.msra.gmra.mxu1 %v3454_v19  ;;  %v2143_v41 = vrot.slane %v2137_v18, %v2142_v34  ;;  %v2147_v43 = vrot.slane %v2137_v18, %v2146_v38  ;;  %v2151_v5 = vrot.slane %v2137_v18, %v2150_v62  ;;  %v2155_v12 = vrot.slane %v2137_v18, %v2154_v0 }
 0x162   : > { %v1881_v28 = vadd.f32 %v1880_v27, %v1839_v26  ;;  %v1841_v29 = vpop.f32.mrf.mxu0 }
 0x163   : > { %v1882_v30 = vpop.f32.mrf.mxu1 }
 0x164   : > { %v1883_v31 = vadd.f32 %v1882_v30, %v1841_v29  ;;  %v1843_v32 = vpop.f32.mrf.mxu0 }
 0x165   : > { %v1884_v33 = vpop.f32.mrf.mxu1 }
 0x166   : > { %v1844_v8 = vpop.f32.mrf.mxu0 }
 0x167   : > { %v1885_v9 = vpop.f32.mrf.mxu1 }
 0x1a0   : > { %v1921_v39 = vpop.f32.mrf.mxu0 }
 0x1a1   : > { %v1962_v35 = vpop.f32.mrf.mxu1  ;;  %v1922_v36 = vadd.f32 %v1921_v39, %v1881_v28 }
 0x1a2   : > { %v1923_v19 = vpop.f32.mrf.mxu0 }
 0x1a3   : > { %v1964_v37 = vpop.f32.mrf.mxu1  ;;  %v1963_v40 = vadd.f32 %v1962_v35, %v1922_v36  ;;  %v1924_v42 = vadd.f32 %v1923_v19, %v1883_v31 }
 0x1a4   : > { %v1925_v44 = vpop.f32.mrf.mxu0 }
 0x1a5   : > { %v1966_v45 = vpop.f32.mrf.mxu1  ;;  %v1965_v46 = vadd.f32 %v1964_v37, %v1924_v42  ;;  %v2160_v50 = vmul.f32 %v2143_v41, %v1963_v40 }
 0x1a6   : > { %v1926_v47 = vpop.f32.mrf.mxu0 }
 0x1a7   : > { %v1967_v48 = vpop.f32.mrf.mxu1  ;;  %v2161_v51 = vmul.f32 %v2147_v43, %v1965_v46 }
 0x1a9   : > { %v2164_v52 = vadd.f32 %v2161_v51, %v2160_v50 }
 0x1e0   : > { %v2003_v54 = vpop.f32.mrf.mxu0 }
 0x1e1   : > { %v2044_v55 = vpop.f32.mrf.mxu1 }
 0x1e2   : > { %v2005_v56 = vpop.f32.mrf.mxu0  ;;  %v2045_v63 = vadd.f32 %v2044_v55, %v2003_v54 }
 0x1e3   : > { %v2046_v57 = vpop.f32.mrf.mxu1 }
 0x1e4   : > { %v2007_v58 = vpop.f32.mrf.mxu0  ;;  %v2047_v3 = vadd.f32 %v2046_v57, %v2005_v56 }
 0x1e5   : > { %v2048_v59 = vpop.f32.mrf.mxu1 }
 0x1e6   : > { %v2008_v60 = vpop.f32.mrf.mxu0 }
 0x1e7   : > { %v2049_v61 = vpop.f32.mrf.mxu1 }
 0x220   : > { %v2085_v1 = vpop.f32.mrf.mxu0 }
 0x221   : > { %v2126_v2 = vpop.f32.mrf.mxu1  ;;  %v2086_v4 = vadd.f32 %v2085_v1, %v2045_v63 }
 0x222   : > { %v2087_v6 = vpop.f32.mrf.mxu0 }
 0x223   : > { %v2128_v7 = vpop.f32.mrf.mxu1  ;;  %v2127_v10 = vadd.f32 %v2126_v2, %v2086_v4  ;;  %v2088_v11 = vadd.f32 %v2087_v6, %v2047_v3 }
 0x224   : > { %v2089_v13 = vpop.f32.mrf.mxu0 }
 0x225   : > { %v2130_v14 = vpop.f32.mrf.mxu1  ;;  %v2162_v15 = vmul.f32 %v2151_v5, %v2127_v10  ;;  %v2129_v16 = vadd.f32 %v2128_v7, %v2088_v11 }
 0x226   : > { %v2090_v17 = vpop.f32.mrf.mxu0 }
 0x227   : > { %v2131_v20 = vpop.f32.mrf.mxu1  ;;  %v2163_v21 = vmul.f32 %v2155_v12, %v2129_v16  ;;  %v2165_v22 = vadd.f32 %v2164_v52, %v2162_v15 }
 0x229   : > { %v2166_v23 = vadd.f32 %v2165_v22, %v2163_v21 }
 0x22b   : > { %2167 = vadd.xlane.f32.xlu0 %v2166_v23 }
 0x2b3   : > { %2175 = sbr.rel (%p2531_p11) target bundleno = 738 (0x2e2), region = 56 }
 0x2b4   : > { %v2168_v25 = vpop.xlane.xlu0 %2167 }
 0x2b5   : > { %v2169_v26 = vadd.f32 %v2168_v25, %v2138_v24 }
 0x2b7   : > { %2171 = vst.msk [vmem:[#allocation2] sm:$0xff] %vm2170_vm1, %v2169_v26 }
 0x2b8   : > { %v2532_v28 = vld [vmem:[#allocation3] ss:$0 sm:$0xff] }
 0x2be   : > { %v2176_v27 = vld [vmem:[#allocation2] sm:$0xff] }
 0x2bf   : > { %v2184_v29 = vadd.f32 %v2532_v28, %v2176_v27 }
 0x2c1   : > { %v2533_v30 = vmul.f32 -1.442695, %v2184_v29 }
 0x2c3   : > { %2993 = vpow2.f32 %v2533_v30 }
 0x2d0   : > { %v2994_v31 = vpop.eup %2993 }
 0x2d1   : > { %v2188_v32 = vadd.f32 1.0, %v2994_v31 }
 0x2d3   : > { %2995 = vrcp.f32 %v2188_v32 }
 0x2e0   : > { %v2996_v33 = vpop.eup %2995 }
 0x2e1   : > { %2191 = vst.msk [vmem:[%s3614_s4] sm:$0xff] %vm2170_vm1, %v2996_v33 }
 0x2e2 PF: > { %p17_p4 = scmp.ge.s32.totalorder %s3178_s21, 4   ;;  %s3632_s17 = smov %s3111_s18 }
 0x2e3   : > { %s3633_s18 = smov %s3115_s19  ;;  %s3634_s19 = smov %s3188_s24 }
 0x2e4   : > { %s3635_s20 = smov %s3178_s21  ;;  %19 = sbr.rel (!%p17_p4) target bundleno = 7 (0x7), region = 90 }
 0x2e9   :  { %2203 = vsyncpa [#allocation5], 1 }
 0x2ea   :  { %2205 = vsyncpa [#allocation5 + $0x1], 1 }
 0x2eb   :  { %2206 = vsyncpa [#allocation7], 1 }
 0x2ec   :  { %2208 = vsyncpa [#allocation7 + $0x1], 1 }

</bundles_post_ra>
